<compile_context>
chip_gen: v7x
topology: tpu7x:2x2x1
jax: 0.10.0
libtpu: 0.0.40
codegen_flags: <defaults>
</compile_context>

<pallas_src>
import functools

import jax
import jax.numpy as jnp
from jax import lax
from jax.experimental import pallas as pl
from jax.experimental.pallas import tpu as pltpu


def _round_up(a, b):
    return ((a + b - 1) // b) * b


def _pick_tk(d_ff, tk_req):
    """Reduction tile: multiple of 128 that divides the (128-padded) d_ff."""
    d_ff_pad = _round_up(d_ff, 128)
    tk = max(128, (min(tk_req, d_ff_pad) // 128) * 128)
    while d_ff_pad % tk != 0:          # terminates: 128 always divides d_ff_pad
        tk -= 128
    return tk, d_ff_pad


def _shrink_tk(tk, d_ff_pad):
    tk_new = tk - 128
    while tk_new >= 128 and d_ff_pad % tk_new != 0:
        tk_new -= 128
    return max(tk_new, 128)


def _vmem_bytes(tm, tk, d_model, x_b, w_b, o_b, wbuf):
    return int(
        2 * tm * d_model * x_b             # x tile (double-buffered)
        + wbuf * tk * d_model * w_b        # w1 block stream
        + wbuf * d_model * tk * w_b        # w2 block stream
        + 2 * (tk + d_model) * 4           # bias blocks
        + 2 * tm * d_model * o_b           # output tile
        + tm * d_model * 4                 # f32 accumulator scratch
        + tm * tk * (4 + 2))               # f32 intermediate h + bf16 copy


def _ffn_kernel(x_ref, w1_ref, b1_ref, w2_ref, b2_ref, o_ref, acc_ref, *,
                compute_dtype):
    # x_ref:   (tm, d_model)              b1_ref: (1, tk)       f32
    # w1_ref:  (tk, d_model)              b2_ref: (1, d_model)  f32
    # w2_ref:  (d_model, tk)
    # o_ref:   (tm, d_model) out dtype
    # acc_ref: (tm, d_model) f32 scratch, resident across the k (d_ff) axis
    k = pl.program_id(1)

    @pl.when(k == 0)
    def _init():
        # Fold the b2 bias into the accumulator once per output tile.
        acc_ref[...] = jnp.broadcast_to(b2_ref[...], acc_ref.shape)

    # In-kernel casts (VPU, hidden under the MXU) avoid wrapper HBM cast passes.
    xv = x_ref[...]
    if xv.dtype != compute_dtype:
        xv = xv.astype(compute_dtype)
    w1v = w1_ref[...]
    if w1v.dtype != compute_dtype:
        w1v = w1v.astype(compute_dtype)
    w2v = w2_ref[...]
    if w2v.dtype != compute_dtype:
        w2v = w2v.astype(compute_dtype)

    # h = relu(x @ w1_blk^T + b1_blk); f32 accumulate on the MXU.
    h = lax.dot_general(xv, w1v,
                        dimension_numbers=(((1,), (1,)), ((), ())),
                        preferred_element_type=jnp.float32)
    h = jnp.maximum(h + b1_ref[...], 0.0)          # bias + ReLU in f32 (VPU)
    # dropout == identity (eval mode)

    # acc += h @ w2_blk^T
    acc_ref[...] += lax.dot_general(
        h.astype(compute_dtype), w2v,
        dimension_numbers=(((1,), (1,)), ((), ())),
        preferred_element_type=jnp.float32)

    @pl.when(k == pl.num_programs(1) - 1)
    def _finalize():
        o_ref[...] = acc_ref[...].astype(o_ref.dtype)


def prepare_ffn_weights(w1, w2, compute_dtype=jnp.bfloat16):
    """One-time cast of the nn.Linear weights to the MXU compute dtype.

    Cache the result at the caller to avoid a per-call HBM cast pass and to
    halve the per-row-tile weight streaming traffic."""
    return w1.astype(compute_dtype), w2.astype(compute_dtype)


def positional_wise_feed_forward(x, w1, b1, w2, b2, *, tm=None, tk=512,
                                 compute_dtype=jnp.bfloat16, out_dtype=None):
    """x: (B, S, d_model); w1: (d_ff, d_model); b1: (d_ff,);
       w2: (d_model, d_ff); b2: (d_model,)   (nn.Linear layouts)."""
    B, S, d_model = x.shape
    d_ff = w1.shape[0]
    M = B * S
    out_dtype = x.dtype if out_dtype is None else out_dtype

    # ---- reduction (d_ff) tiling; pad ragged d_ff with zero rows/cols ---------
    tk, d_ff_pad = _pick_tk(d_ff, tk)
    if d_ff_pad != d_ff:
        # Zero-padded hidden units: relu(0 + 0) = 0, times zero w2 columns = 0.
        pad = d_ff_pad - d_ff
        w1 = jnp.pad(w1, ((0, pad), (0, 0)))
        b1 = jnp.pad(b1, ((0, pad),))
        w2 = jnp.pad(w2, ((0, 0), (0, pad)))

    # ---- token (row) tiling ----------------------------------------------------
    if tm is None:
        tm = 1024      # >= v6e/v7x FLOP/byte balance point for weight streaming
    if M <= 8:
        tm = M
    elif M <= tm:
        tm = _round_up(-(-M // 2), 8)   # >=2 tiles -> both TensorCores on v7x
    else:
        tm = _round_up(min(tm, M), 8)

    # ---- generation-aware VMEM budget ------------------------------------------
    try:
        vmem_cap = int(pltpu.get_tpu_info().vmem_capacity_bytes)
    except Exception:
        vmem_cap = 64 * 1024 * 1024     # conservative (v7x per-core) fallback
    vmem_budget = max(vmem_cap - 16 * 1024 * 1024, 32 * 1024 * 1024)

    x_b = jnp.dtype(x.dtype).itemsize
    w_b = max(jnp.dtype(w1.dtype).itemsize, jnp.dtype(w2.dtype).itemsize)
    o_b = jnp.dtype(out_dtype).itemsize

    grid_k = d_ff_pad // tk
    # Deeper weight-stream buffering only on 128 MiB chips with enough k steps.
    wbuf = 3 if (vmem_budget >= 96 * 1024 * 1024 and grid_k >= 3
                 and hasattr(pl, "Buffered")) else 2

    while _vmem_bytes(tm, tk, d_model, x_b, w_b, o_b, wbuf) > vmem_budget:
        if wbuf > 2:
            wbuf = 2
        elif tk > 128:
            tk = _shrink_tk(tk, d_ff_pad)     # shrink tk before tm (tm = intensity)
        elif tm > 8:
            tm = _round_up(max(tm // 2, 8), 8)
        else:
            break
    grid_k = d_ff_pad // tk
    grid_m = pl.cdiv(M, tm)

    vmem_needed = _vmem_bytes(tm, tk, d_model, x_b, w_b, o_b, wbuf)
    vmem_limit = int(min(vmem_budget,
                         max(vmem_needed + vmem_needed // 4 + (2 << 20),
                             16 * 1024 * 1024)))

    # ---- operands: no wrapper-side cast/pad passes over x -----------------------
    x2d = x.reshape(M, d_model)                       # free view
    b1r = b1.astype(jnp.float32).reshape(1, d_ff_pad)  # tiny
    b2r = b2.astype(jnp.float32).reshape(1, d_model)

    cost = pl.CostEstimate(
        flops=int(4 * grid_m * tm * d_model * d_ff_pad),   # two matmuls
        transcendentals=0,
        bytes_accessed=int(grid_m * tm * d_model * x_b
                           + M * d_model * o_b
                           # weights + biases are re-streamed once per row tile
                           + grid_m * d_ff_pad * d_model * 2 * w_b
                           + grid_m * (d_ff_pad + d_model) * 4))

    kernel = functools.partial(_ffn_kernel, compute_dtype=compute_dtype)

    def _call(weight_buffers):
        w_kwargs = ({"pipeline_mode": pl.Buffered(weight_buffers)}
                    if weight_buffers > 2 else {})
        grid_spec = pltpu.PrefetchScalarGridSpec(
            num_scalar_prefetch=0,
            grid=(grid_m, grid_k),          # (token tiles, d_ff reduction)
            in_specs=[
                pl.BlockSpec((tm, d_model), lambda i, k: (i, 0)),              # x
                pl.BlockSpec((tk, d_model), lambda i, k: (k, 0), **w_kwargs),  # w1
                pl.BlockSpec((1, tk),       lambda i, k: (0, k)),              # b1
                pl.BlockSpec((d_model, tk), lambda i, k: (0, k), **w_kwargs),  # w2
                pl.BlockSpec((1, d_model),  lambda i, k: (0, 0)),              # b2
            ],
            out_specs=pl.BlockSpec((tm, d_model), lambda i, k: (i, 0)),
            scratch_shapes=[pltpu.VMEM((tm, d_model), jnp.float32)],
        )
        return pl.pallas_call(
            kernel,
            out_shape=jax.ShapeDtypeStruct((M, d_model), out_dtype),
            grid_spec=grid_spec,
            compiler_params=pltpu.CompilerParams(
                dimension_semantics=("parallel", "arbitrary"),
                vmem_limit_bytes=vmem_limit),
            cost_estimate=cost,
        )(x2d, w1, b1r, w2, b2r)

    if wbuf > 2:
        try:
            out2d = _call(wbuf)
        except Exception:   # pipeline_mode unsupported -> default double-buffer
            out2d = _call(2)
    else:
        out2d = _call(2)

    return out2d.reshape(B, S, d_model)


def _ref_forward(x, w1, b1, w2, b2):
    h = jnp.maximum(jnp.einsum("bsd,fd->bsf", x, w1) + b1, 0.0)
    return jnp.einsum("bsf,df->bsd", h, w2) + b2


if __name__ == "__main__":
    # Small but lane-friendly demo shapes (d_model multiple of 128 avoids
    # masked partial stores).  Note: d_model < 256 under-fills the v6e/v7x MXU
    # for dot1; the kernel targets d_model >= 256 in production.
    B, S, d_model, d_ff = 2, 8, 128, 256

    key = jax.random.PRNGKey(0)
    kx, k1, k2, k3, k4 = jax.random.split(key, 5)

    x = jax.random.normal(kx, (B, S, d_model), dtype=jnp.float32)

    # Deterministic nn.Linear-style init (uniform in +/- 1/sqrt(fan_in)).
    bound1 = 1.0 / (d_model ** 0.5)
    bound2 = 1.0 / (d_ff ** 0.5)
    w1 = jax.random.uniform(k1, (d_ff, d_model), jnp.float32, -bound1, bound1)
    b1 = jax.random.uniform(k2, (d_ff,), jnp.float32, -bound1, bound1)
    w2 = jax.random.uniform(k3, (d_model, d_ff), jnp.float32, -bound2, bound2)
    b2 = jax.random.uniform(k4, (d_model,), jnp.float32, -bound2, bound2)

    # Recommended amortized path: cast the weights to bf16 once at the caller.
    w1_c, w2_c = prepare_ffn_weights(w1, w2)

    out = positional_wise_feed_forward(x, w1_c, b1, w2_c, b2)
    out = jax.block_until_ready(out)

    ref = _ref_forward(x, w1, b1, w2, b2)
    assert out.shape == (B, S, d_model)
    # bf16 operands / f32 accumulation -> loose-ish tolerance vs f32 reference.
    assert jnp.allclose(out, ref, atol=2e-2, rtol=2e-2), "mismatch vs reference"

    print("KERNEL_OK")
</pallas_src>

<mosaic_0001>
module attributes {stable_mosaic.version = 11 : i64} {
  func.func @_ffn_kernel(%arg0: i32, %arg1: i32, %arg2: memref<8x128xf32, #tpu.memory_space<vmem>>, %arg3: memref<256x128xbf16, #tpu.memory_space<vmem>>, %arg4: memref<1x256xf32, #tpu.memory_space<vmem>>, %arg5: memref<128x256xbf16, #tpu.memory_space<vmem>>, %arg6: memref<1x128xf32, #tpu.memory_space<vmem>>, %arg7: memref<8x128xf32, #tpu.memory_space<vmem>>, %arg8: memref<8x128xf32, #tpu.memory_space<vmem>>) attributes {dimension_semantics = [#tpu.dimension_semantics<parallel>, #tpu.dimension_semantics<arbitrary>], iteration_bounds = array<i64: 2, 1>, scalar_prefetch = 0 : i64, scratch_operands = 1 : i64, tpu.core_type = #tpu.core_type<tc>, window_params = [{transform_indices = @transform_0, window_bounds = array<i64: 8, 128>}, {transform_indices = @transform_1, window_bounds = array<i64: 256, 128>}, {transform_indices = @transform_2, window_bounds = array<i64: 1, 256>}, {transform_indices = @transform_3, window_bounds = array<i64: 128, 256>}, {pipeline_mode = #tpu.pipeline_mode<synchronous>, transform_indices = @transform_4, window_bounds = array<i64: 1, 128>}, {transform_indices = @transform_5, window_bounds = array<i64: 8, 128>}]} {
    %c0_i32 = arith.constant 0 : i32
    %0 = arith.cmpi eq, %arg1, %c0_i32 : i32
    %1 = arith.extui %0 : i1 to i32
    %c0_i32_0 = arith.constant 0 : i32
    %2 = arith.cmpi ne, %1, %c0_i32_0 : i32
    scf.if %2 {
      %c0_16 = arith.constant 0 : index
      %c0_17 = arith.constant 0 : index
      %21 = vector.load %arg6[%c0_16, %c0_17] : memref<1x128xf32, #tpu.memory_space<vmem>>, vector<1x128xf32>
      %22 = vector.shape_cast %21 : vector<1x128xf32> to vector<1x128xf32>
      %23 = vector.broadcast %22 : vector<1x128xf32> to vector<8x128xf32>
      %c0_18 = arith.constant 0 : index
      %c0_19 = arith.constant 0 : index
      %24 = vector.load %arg8[%c0_18, %c0_19] : memref<8x128xf32, #tpu.memory_space<vmem>>, vector<8x128xf32>
      tpu.vector_store %arg8[%c0_18, %c0_19], %23 {strides = array<i32>} : memref<8x128xf32, #tpu.memory_space<vmem>>, vector<8x128xf32>,
    } else {
    }
    %c0 = arith.constant 0 : index
    %c0_1 = arith.constant 0 : index
    %3 = vector.load %arg2[%c0, %c0_1] : memref<8x128xf32, #tpu.memory_space<vmem>>, vector<8x128xf32>
    %4 = arith.truncf %3 : vector<8x128xf32> to vector<8x128xbf16>
    %c0_2 = arith.constant 0 : index
    %c0_3 = arith.constant 0 : index
    %5 = vector.load %arg3[%c0_2, %c0_3] : memref<256x128xbf16, #tpu.memory_space<vmem>>, vector<256x128xbf16>
    %c0_4 = arith.constant 0 : index
    %c0_5 = arith.constant 0 : index
    %6 = vector.load %arg5[%c0_4, %c0_5] : memref<128x256xbf16, #tpu.memory_space<vmem>>, vector<128x256xbf16>
    %cst = arith.constant dense<0.000000e+00> : vector<8x256xf32>
    %7 = tpu.matmul %4, %5, %cst {dimension_numbers = #tpu.dot_dimension_numbers<[1], [1], [0], [0], [0, 0, 1, 0], [], []>} : vector<8x128xbf16>, vector<256x128xbf16>, vector<8x256xf32> -> vector<8x256xf32>
    %c0_6 = arith.constant 0 : index
    %c0_7 = arith.constant 0 : index
    %8 = vector.load %arg4[%c0_6, %c0_7] : memref<1x256xf32, #tpu.memory_space<vmem>>, vector<1x256xf32>
    %9 = vector.broadcast %8 : vector<1x256xf32> to vector<8x256xf32>
    %10 = arith.addf %7, %9 : vector<8x256xf32>
    %cst_8 = arith.constant 0.000000e+00 : f32
    %11 = vector.broadcast %cst_8 : f32 to vector<8x256xf32>
    %12 = arith.maximumf %10, %11 : vector<8x256xf32>
    %c0_9 = arith.constant 0 : index
    %c0_10 = arith.constant 0 : index
    %13 = vector.load %arg8[%c0_9, %c0_10] : memref<8x128xf32, #tpu.memory_space<vmem>>, vector<8x128xf32>
    %14 = arith.truncf %12 : vector<8x256xf32> to vector<8x256xbf16>
    %cst_11 = arith.constant dense<0.000000e+00> : vector<8x128xf32>
    %15 = tpu.matmul %14, %6, %cst_11 {dimension_numbers = #tpu.dot_dimension_numbers<[1], [1], [0], [0], [0, 0, 1, 0], [], []>} : vector<8x256xbf16>, vector<128x256xbf16>, vector<8x128xf32> -> vector<8x128xf32>
    %16 = arith.addf %13, %15 : vector<8x128xf32>
    %c0_12 = arith.constant 0 : index
    %c0_13 = arith.constant 0 : index
    %17 = vector.load %arg8[%c0_12, %c0_13] : memref<8x128xf32, #tpu.memory_space<vmem>>, vector<8x128xf32>
    tpu.vector_store %arg8[%c0_12, %c0_13], %16 {strides = array<i32>} : memref<8x128xf32, #tpu.memory_space<vmem>>, vector<8x128xf32>,
    %c0_i32_14 = arith.constant 0 : i32
    %18 = arith.cmpi eq, %arg1, %c0_i32_14 : i32
    %19 = arith.extui %18 : i1 to i32
    %c0_i32_15 = arith.constant 0 : i32
    %20 = arith.cmpi ne, %19, %c0_i32_15 : i32
    scf.if %20 {
      %c0_16 = arith.constant 0 : index
      %c0_17 = arith.constant 0 : index
      %21 = vector.load %arg8[%c0_16, %c0_17] : memref<8x128xf32, #tpu.memory_space<vmem>>, vector<8x128xf32>
      %c0_18 = arith.constant 0 : index
      %c0_19 = arith.constant 0 : index
      %22 = vector.load %arg7[%c0_18, %c0_19] : memref<8x128xf32, #tpu.memory_space<vmem>>, vector<8x128xf32>
      tpu.vector_store %arg7[%c0_18, %c0_19], %21 {strides = array<i32>} : memref<8x128xf32, #tpu.memory_space<vmem>>, vector<8x128xf32>,
    } else {
    }
    return
  }
  func.func @transform_0(%arg0: i32, %arg1: i32) -> (i32, i32) {
    %c0_i32 = arith.constant 0 : i32
    %c0_i32_0 = arith.constant 0 : i32
    return %arg0, %c0_i32 : i32, i32
  }
  func.func @transform_1(%arg0: i32, %arg1: i32) -> (i32, i32) {
    %c0_i32 = arith.constant 0 : i32
    %c0_i32_0 = arith.constant 0 : i32
    return %arg1, %c0_i32 : i32, i32
  }
  func.func @transform_2(%arg0: i32, %arg1: i32) -> (i32, i32) {
    %c0_i32 = arith.constant 0 : i32
    %c0_i32_0 = arith.constant 0 : i32
    return %c0_i32, %arg1 : i32, i32
  }
  func.func @transform_3(%arg0: i32, %arg1: i32) -> (i32, i32) {
    %c0_i32 = arith.constant 0 : i32
    %c0_i32_0 = arith.constant 0 : i32
    return %c0_i32, %arg1 : i32, i32
  }
  func.func @transform_4(%arg0: i32, %arg1: i32) -> (i32, i32) {
    %c0_i32 = arith.constant 0 : i32
    %c0_i32_0 = arith.constant 0 : i32
    %c0_i32_1 = arith.constant 0 : i32
    return %c0_i32, %c0_i32_0 : i32, i32
  }
  func.func @transform_5(%arg0: i32, %arg1: i32) -> (i32, i32) {
    %c0_i32 = arith.constant 0 : i32
    %c0_i32_0 = arith.constant 0 : i32
    return %arg0, %c0_i32 : i32, i32
  }
}

</mosaic_0001>

<bundles_post_ra>
// kernel: tpu_custom_call.1
= control target key start
LH: loop header
LB: loop body
LE: loop exit
PB: predicated region body
PF: predicated region fallthrough
CT: control target
= control target key end

     0   :  { %10 = vsyncpa [#allocation4], 0  ;;  %s1457_s0 = inlined_call_operand.hbm [shape: f32[16,128], index: 0, kind: input, shape index: {}]   ;;  %s1458_s1 = inlined_call_operand.hbm [shape: bf16[256,128], index: 1, kind: input, shape index: {}]   ;;  %s1459_s2 = inlined_call_operand.vmem [shape: f32[1,256], index: 2, kind: input, shape index: {}]   ;;  %s1460_s3 = inlined_call_operand.hbm [shape: bf16[128,256], index: 3, kind: input, shape index: {}]   ;;  %s1461_s4 = inlined_call_operand.vmem [shape: f32[1,128], index: 4, kind: input, shape index: {}]   ;;  %s1462_s5 = inlined_call_operand.hbm [shape: f32[16,128], index: 5, kind: output, shape index: {}]  }
   0x1   :  { %12 = vsyncpa [#allocation4 + $0x1], 0 }
   0x2   :  { %13 = vsyncpa [#allocation7], 0 }
   0x3   :  { %14 = vsyncpa [#allocation5], 0 }
   0x4   :  { %16 = vsyncpa [#allocation5 + $0x1], 0  ;;  %s1197_s18 = smov 0   ;;  %s1199_s19 = smov 0  }
   0x5   :  { %s1201_s20 = smov 0   ;;  %s1203_s21 = smov 0  }
   0x6   :  { %s1205_s22 = smov 0   ;;  %s1207_s23 = smov 0  }
   0x7 LB: > { %s789_s24 = sadd.s32 4294967295, %s1157_s23   ;;  %s790_s25 = sadd.s32 4294967294, %s1157_s23   ;;  %s1157_s23 = sphi %s1207_s23, %s22_s23   ;;  %s1153_s22 = sphi %s1205_s22, %s1484_s22   ;;  %s1149_s21 = sphi %s1203_s21, %s1483_s21   ;;  %s1145_s20 = sphi %s1201_s20, %s1482_s20   ;;  %s1141_s19 = sphi %s1199_s19, %s1481_s19   ;;  %s1137_s18 = sphi %s1197_s18, %s1480_s18  }
   0x8   : > { %p54_p0 = scmp.ne.s32.totalorder %s1141_s19, %s1137_s18  ;;  %p1231_p1 = scmp.eq.s32.totalorder %s789_s24, 0 }
   0x9   : > { %p1235_p2 = scmp.eq.s32.totalorder %s789_s24, 1  ;;  %p183_p3 = scmp.eq.s32.totalorder %s790_s25, 1 }
   0xa   : > { %s1467_s26 = scalar_select %p1231_p1, 1, 0 }
   0xb   : > { %p1241_p4 = por %p1231_p1, %p54_p0  ;;  %p791_p5 = scmp.ge.s32.totalorder %s1157_s23, 1 }
   0xc   : > { %p1246_p6 = por %p183_p3, %p54_p0  ;;  %p190_p7 = scmp.lt.s32.totalorder %s1157_s23, 3 }
   0xd   : > { %s1469_s28 = scalar_select %p1241_p4, 1, 0 }
   0xe   : > { %s1470_s29 = scalar_select %p1246_p6, 1, 0 }
   0xf   : > { %p1251_p8 = pnand %p791_p5, %p190_p7  ;;  %s1159_s6 = smov [#allocation6]  }
  0x10   : > { %s205_s7 = sshll.u32 %s1159_s6, 4  ;;  %s1160_s9 = smov [#allocation8]   ;;  %s1255_s7 = int_to_ptr.vmem [resolvable:$true] %s205_s7 }
  0x11   : > { %p870_p9 = pneg %p1251_p8  ;;  %s229_s10 = sshll.u32 %s1160_s9, 4  ;;  %s1266_s10 = int_to_ptr.vmem [resolvable:$true] %s229_s10 }
  0x12   : > { %s985_s13 = scalar_lea.hbm %s1458_s1, 2048 }
  0x13   : > { %p1262_p11 = pnand %p870_p9, %p1231_p1  ;;  %p986_p12 = scmp.ne.s32.totalorder %s1458_s1, %s985_s13 }
  0x14   : > { %p992_p5 = scmp.lt.u32.totalorder %s985_s13, %s1458_s1 }
  0x15   : > { %p987_p13 = pneg %p1262_p11 }
  0x17   : > { %p988_p0 = pnand %p987_p13, %p986_p12 }
  0x19   : > { %p989_p3 = pneg %p988_p0 }
  0x1b   : > { %p994_p7 = pnand %p992_p5, %p989_p3 }
  0x1d   : > { %997 = shalt.err (!%p994_p7)
}
  0x1e   : > { %s998_s24 = scalar_lea.vmem %s1255_s7, 2048  ;;  %p1006_p1 = scmp.lt.s32.totalorder %s1255_s7, %s1255_s7 }
  0x1f   : > { %p999_p9 = scmp.ne.s32.totalorder %s1255_s7, %s998_s24  ;;  %p1007_p12 = scmp.lt.s32.totalorder %s998_s24, %s998_s24 }
  0x21   : > { %p1001_p10 = pnand %p999_p9, %p987_p13  ;;  %p1008_p0 = por %p1007_p12, %p1006_p1 }
  0x23   : > { %p1002_p6 = pneg %p1001_p10 }
  0x25   : > { %p1009_p4 = pnand %p1008_p0, %p1002_p6 }
  0x27   : > { %1012 = shalt.err (!%p1009_p4)
}
  0x28   : > { %s1161_s25 = smov 64   ;;  %s1162_s6 = smov 4  }
  0x29   : > { %873 = dma.hbm_to_vmem [thread:$0]  (!%p1262_p11), %s1458_s1, 2048, %s1255_s7, [#allocation7], %s1161_s25, %s1161_s25, %s1162_s6  }
  0x2a   : > { %s1013_s14 = scalar_lea.hbm %s1460_s3, 2048 }
  0x2b   : > { %p1014_p1 = scmp.ne.s32.totalorder %s1460_s3, %s1013_s14  ;;  %p1020_p10 = scmp.lt.u32.totalorder %s1013_s14, %s1460_s3 }
  0x2d   : > { %p1016_p4 = pnand %p1014_p1, %p987_p13 }
  0x2f   : > { %p1017_p6 = pneg %p1016_p4 }
  0x31   : > { %p1022_p3 = pnand %p1020_p10, %p1017_p6 }
  0x33   : > { %1025 = shalt.err (!%p1022_p3)
}
  0x34   : > { %s1026_s7 = scalar_lea.vmem %s1266_s10, 2048  ;;  %p1034_p12 = scmp.lt.s32.totalorder %s1266_s10, %s1266_s10 }
  0x35   : > { %p1027_p5 = scmp.ne.s32.totalorder %s1266_s10, %s1026_s7  ;;  %p1035_p0 = scmp.lt.s32.totalorder %s1026_s7, %s1026_s7 }
  0x37   : > { %p1029_p7 = pnand %p1027_p5, %p987_p13  ;;  %p1036_p1 = por %p1035_p0, %p1034_p12 }
  0x39   : > { %p1030_p9 = pneg %p1029_p7 }
  0x3b   : > { %p1037_p4 = pnand %p1036_p1, %p1030_p9 }
  0x3d   : > { %1040 = shalt.err (!%p1037_p4)
}
  0x3e   : > { %s1163_s25 = smov 128   ;;  %s1164_s6 = smov 8  }
  0x3f   : > { %876 = dma.hbm_to_vmem [thread:$0]  (!%p1262_p11), %s1460_s3, 2048, %s1266_s10, [#allocation7], %s1163_s25, %s1163_s25, %s1164_s6  }
  0x40   : > { %s34_s12 = sadd.s32 1, %s1153_s22  ;;  %s41_s13 = sadd.s32 1, %s1145_s20 }
  0x41   : > { %p36_p13 = scmp.ge.s32.totalorder %s34_s12, 2  ;;  %p48_p6 = scmp.ne.s32.totalorder %s1145_s20, %s1141_s19 }
  0x42   : > { %p49_p10 = scmp.eq.s32.totalorder %s1157_s23, 0  ;;  %p887_p3 = scmp.lt.s32.totalorder %s1157_s23, 2 }
  0x43   : > { %s1486_s12 = smov (%p36_p13, %s34_s12), 0  ;;  %p1330_p7 = por %p1235_p2, %p48_p6 }
  0x44   : > { %p50_p5 = por %p49_p10, %p48_p6  ;;  %s38_s8 = ssub.s32 %s1153_s22, %s1486_s12 }
  0x45   : > { %s1473_s14 = scalar_select %p1330_p7, 1, 0 }
  0x46   : > { %s246_s15 = sand.u32 1, %s1145_s20   ;;  %p39_p9 = scmp.eq.s32.totalorder %s38_s8, 0 }
  0x47   : > { %s796_s10 = sshll.u32 %s246_s15, 3  ;;  %s797_s16 = sshll.u32 %s1153_s22, 7 }
  0x48   : > { %s1339_s17 = scalar_select %p39_p9, %s1145_s20, %s41_s13  }
  0x49   : > { %s1344_s25 = scalar_lea.hbm %s1457_s0, %s797_s16  ;;  %s250_s27 = scalar_lea.vmem [#allocation3], %s796_s10 }
  0x4a   : > { %s257_s6 = sshll.u32 %s250_s27, 4  ;;  %p1348_p2 = pnand %p887_p3, %p50_p5  ;;  %s1352_s6 = int_to_ptr.vmem [resolvable:$true] %s257_s6 }
  0x4b   : > { %s247_s11 = scalar_lea.sflag [#allocation4], %s246_s15  ;;  %s1041_s13 = scalar_lea.hbm %s1344_s25, 128 }
  0x4c   : > { %p1042_p11 = scmp.ne.s32.totalorder %s1344_s25, %s1041_s13  ;;  %p1043_p12 = pneg %p1348_p2 }
  0x4d   : > { %s1046_s16 = scalar_lea.hbm %s1457_s0, 256  ;;  %p1047_p4 = scmp.lt.u32.totalorder %s1344_s25, %s1457_s0 }
  0x4e   : > { %p1044_p0 = pnand %p1043_p12, %p1042_p11  ;;  %p1048_p13 = scmp.lt.u32.totalorder %s1046_s16, %s1041_s13 }
  0x4f   : > { %p1050_p10 = scmp.lt.u32.totalorder %s1041_s13, %s1344_s25 }
  0x50   : > { %p1045_p1 = pneg %p1044_p0  ;;  %p1049_p6 = por %p1048_p13, %p1047_p4 }
  0x52   : > { %p1051_p3 = por %p1050_p10, %p1049_p6 }
  0x54   : > { %p1052_p5 = pnand %p1051_p3, %p1045_p1 }
  0x56   : > { %1055 = shalt.err (!%p1052_p5)
}
  0x57   : > { %s1056_s15 = scalar_lea.vmem %s1352_s6, 128  ;;  %s1165_s27 = smov [#allocation3]  }
  0x58   : > { %p1057_p9 = scmp.ne.s32.totalorder %s1352_s6, %s1056_s15  ;;  %s1061_s8 = sshll.u32 %s1165_s27, 4  ;;  %s1062_s8 = int_to_ptr.vmem [resolvable:$false] %s1061_s8 }
  0x59   : > { %s1063_s10 = scalar_lea.vmem %s1062_s8, 256  ;;  %p1064_p7 = scmp.lt.s32.totalorder %s1352_s6, %s1062_s8 }
  0x5a   : > { %p1059_p11 = pnand %p1057_p9, %p1043_p12  ;;  %p1065_p4 = scmp.lt.s32.totalorder %s1063_s10, %s1056_s15 }
  0x5c   : > { %p1060_p0 = pneg %p1059_p11  ;;  %p1066_p13 = por %p1065_p4, %p1064_p7 }
  0x5e   : > { %p1067_p6 = pnand %p1066_p13, %p1060_p0 }
  0x60   : > { %1070 = shalt.err (!%p1067_p6)
}
  0x61   : > { %880 = dma.hbm_to_vmem [thread:$0]  (!%p1348_p2), %s1344_s25, 128, %s1352_s6, %s247_s11  }
  0x62   : > { %266 = sbr.rel (%p1251_p8) target bundleno = 622 (0x26e), region = 40  ;;  %s1382_s13 = sand.u32 (!%p1251_p8), 1, %s1141_s19  }
  0x63   : > { %s799_s16 = sshll.u32 (!%p1251_p8), %s1382_s13, 3  ;;  %s269_s24 = scalar_lea.sflag (!%p1251_p8), [#allocation4], %s1382_s13 }
  0x64   : > { %s272_s7 = scalar_lea.vmem (!%p1251_p8), [#allocation3], %s799_s16  ;;  %p1475_p7 = scmp.ne.s32.totalorder (!%p1251_p8), %s1469_s28, 0 }
  0x69   : > { %1124 = dma.done.wait (%p1475_p7), %s269_s24, 128  }
  0x6a   : > { %1126 = vsyncadd (%p1475_p7), %s269_s24, 4294967168  ;;  %p1476_p2 = scmp.ne.s32.totalorder %s1467_s26, 0 }
  0x6c   : > { %1128 = dma.done.wait (%p1476_p2), [#allocation7], 4096  }
  0x6d   : > { %1130 = vsyncadd (%p1476_p2), [#allocation7], 4294963200  ;;  %v945_v0 = vld [vmem:[#allocation6 + $0x40] sm:$0xff]   ;;  %v947_v2 = vld [vmem:[#allocation6 + $0x48] sm:$0xff]   ;;  %v383_v34 = vlaneseq  ;;  %s837_s6 = sshll.u32 %s1149_s21, 7  ;;  %s310_s9 = scalar_lea.vmem [#allocation9], %s799_s16 }
  0x6e   : > { %v946_v1 = vld [vmem:[#allocation6] sm:$0xff]   ;;  %840 = vmatprep.subr.bf16.mxu0 %v945_v0  ;;  %v948_v3 = vld [vmem:[#allocation6 + $0x8] sm:$0xff]   ;;  %v949_v4 = vld [vmem:[#allocation6 + $0x50] sm:$0xff]   ;;  %s676_s11 = sshll.u32 %s310_s9, 4  ;;  %s1408_s8 = scalar_lea.hbm %s1462_s5, %s837_s6  ;;  %s1410_s11 = int_to_ptr.vmem [resolvable:$true] %s676_s11 }
  0x6f   : > { %841 = vmatpush3.bf16.xpose.msra.mxu0 %v946_v1  ;;  %v950_v5 = vld [vmem:[#allocation6 + $0x10] sm:$0xff]   ;;  %v951_v6 = vld [vmem:[#allocation6 + $0x58] sm:$0xff]   ;;  %v961_v9 = vld [vmem:[#allocation8 + $0x4] ss:$8 sps:$4 sm:$0xff]   ;;  %v384_v35 = vshrl.u32 %v383_v34, 7  ;;  %s663_s21 = scalar_lea.sflag [#allocation5], %s1382_s13 }
  0x70   : > { %842 = vmatprep.subr.bf16.mxu0 %v947_v2  ;;  %v331_v7 = vld [vmem:[%s272_s7] sm:$0xff]  ;;  %v963_v10 = vld [vmem:[#allocation8] ss:$8 sps:$4 sm:$0xff]   ;;  %615 = vmatprep.subr.bf16.mxu1 %v961_v9  ;;  %v967_v15 = vld [vmem:[#allocation8 + $0x24] ss:$8 sps:$4 sm:$0xff]   ;;  %s1071_s10 = scalar_lea.vmem %s1410_s11, 128 }
  0x71   : > { %v332_v8 = vpack.c.bf16 %v331_v7, %v331_v7  ;;  %v964_v11 = vld [vmem:[#allocation8 + $0x14] ss:$8 sps:$4 sm:$0xff]   ;;  %616 = vmatpush1.bf16.xpose.msra.mxu1 %v963_v10  ;;  %v953_v13 = vld [vmem:[#allocation6 + $0x60] sm:$0xff]   ;;  %v966_v14 = vld [vmem:[#allocation8 + $0x10] ss:$8 sps:$4 sm:$0xff]   ;;  %v385_v36 = vsub.s32 0, %v384_v35  ;;  %p1072_p8 = scmp.ne.s32.totalorder %s1410_s11, %s1071_s10 }
  0x72   : > { %617 = vmatprep.subr.bf16.mxu1 %v964_v11  ;;  %v952_v12 = vld [vmem:[#allocation6 + $0x18] sm:$0xff]   ;;  %v954_v16 = vld [vmem:[#allocation6 + $0x20] sm:$0xff]   ;;  %v955_v17 = vld [vmem:[#allocation6 + $0x68] sm:$0xff]   ;;  %v389_v38 = vsub.s32 1, %v384_v35  ;;  %p1477_p12 = scmp.ne.s32.totalorder %s1473_s14, 0  ;;  %s1166_s16 = smov [#allocation9]  }
  0x73   : > { %856 = vmatprep.mubr.bf16.mxu0 %v332_v8  ;;  %v969_v18 = vld [vmem:[#allocation8 + $0x20] ss:$8 sps:$4 sm:$0xff]   ;;  %v970_v19 = vld [vmem:[#allocation8 + $0x34] ss:$8 sps:$4 sm:$0xff]   ;;  %v972_v22 = vld [vmem:[#allocation8 + $0x30] ss:$8 sps:$4 sm:$0xff]  }
  0x74   : > { %v956_v20 = vld [vmem:[#allocation6 + $0x28] sm:$0xff]   ;;  %v957_v21 = vld [vmem:[#allocation6 + $0x70] sm:$0xff]   ;;  %v959_v25 = vld [vmem:[#allocation6 + $0x78] sm:$0xff]   ;;  %p1073_p1 = pnand %p1072_p8, %p1477_p12  ;;  %s1075_s24 = sshll.u32 %s1166_s16, 4  ;;  %s1076_s24 = int_to_ptr.vmem [resolvable:$false] %s1075_s24 }
  0x75   : > { %v973_v23 = vld [vmem:[#allocation8 + $0x44] ss:$8 sps:$4 sm:$0xff]   ;;  %v958_v24 = vld [vmem:[#allocation6 + $0x30] sm:$0xff]   ;;  %v975_v26 = vld [vmem:[#allocation8 + $0x40] ss:$8 sps:$4 sm:$0xff]   ;;  %s1077_s7 = scalar_lea.vmem %s1076_s24, 256  ;;  %p1078_p3 = scmp.lt.s32.totalorder %s1410_s11, %s1076_s24 }
  0x76   : > { %v976_v27 = vld [vmem:[#allocation8 + $0x54] ss:$8 sps:$4 sm:$0xff]   ;;  %v978_v29 = vld [vmem:[#allocation8 + $0x50] ss:$8 sps:$4 sm:$0xff]   ;;  %v979_v30 = vld [vmem:[#allocation8 + $0x64] ss:$8 sps:$4 sm:$0xff]   ;;  %p1074_p10 = pneg %p1073_p1  ;;  %p1079_p5 = scmp.lt.s32.totalorder %s1077_s7, %s1071_s10 }
  0x77   : > { %843 = vmatpush3.bf16.xpose.msra.mxu0 %v948_v3  ;;  %v960_v28 = vld [vmem:[#allocation6 + $0x38] sm:$0xff]   ;;  %v981_v31 = vld [vmem:[#allocation8 + $0x60] ss:$8 sps:$4 sm:$0xff]   ;;  %v381_v37 = vld [vmem:[%s1459_s2] sm:$0x3] }
  0x78   : > { %844 = vmatprep.subr.bf16.mxu0 %v949_v4  ;;  %v982_v32 = vld [vmem:[#allocation8 + $0x74] ss:$8 sps:$4 sm:$0xff]   ;;  %v984_v33 = vld [vmem:[#allocation8 + $0x70] ss:$8 sps:$4 sm:$0xff]   ;;  %v386_v39 = vrot.slane %v381_v37, %v385_v36  ;;  %v390_v40 = vrot.slane %v381_v37, %v389_v38  ;;  %p1080_p9 = por %p1079_p5, %p1078_p3 }
  0x79   : > { %618 = vmatpush1.bf16.xpose.msra.mxu1 %v966_v14  ;;  %v803_v51 = vld [vmem:[%s1461_s4] ss:$0 sm:$0xff] }
  0x7a   : > { %619 = vmatprep.subr.bf16.mxu1 %v967_v15  ;;  %p1081_p11 = pnand %p1080_p9, %p1074_p10 }
  0x7f   : > { %845 = vmatpush3.bf16.xpose.msra.mxu0 %v950_v5 }
  0x80   : > { %846 = vmatprep.subr.bf16.mxu0 %v951_v6 }
  0x81   : > { %620 = vmatpush1.bf16.xpose.msra.mxu1 %v969_v18 }
  0x82   : > { %621 = vmatprep.subr.bf16.mxu1 %v970_v19 }
  0x87   : > { %847 = vmatpush3.bf16.xpose.msra.mxu0 %v952_v12 }
  0x88   : > { %848 = vmatprep.subr.bf16.mxu0 %v953_v13 }
  0x89   : > { %622 = vmatpush1.bf16.xpose.msra.mxu1 %v972_v22 }
  0x8a   : > { %623 = vmatprep.subr.bf16.mxu1 %v973_v23 }
  0x8f   : > { %849 = vmatpush3.bf16.xpose.msra.mxu0 %v954_v16 }
  0x90   : > { %850 = vmatprep.subr.bf16.mxu0 %v955_v17 }
  0x91   : > { %624 = vmatpush1.bf16.xpose.msra.mxu1 %v975_v26 }
  0x92   : > { %625 = vmatprep.subr.bf16.mxu1 %v976_v27 }
  0x97   : > { %851 = vmatpush3.bf16.xpose.msra.mxu0 %v956_v20 }
  0x98   : > { %852 = vmatprep.subr.bf16.mxu0 %v957_v21 }
  0x99   : > { %626 = vmatpush1.bf16.xpose.msra.mxu1 %v978_v29 }
  0x9a   : > { %627 = vmatprep.subr.bf16.mxu1 %v979_v30 }
  0x9f   : > { %853 = vmatpush3.bf16.xpose.msra.mxu0 %v958_v24 }
  0xa0   : > { %854 = vmatprep.subr.bf16.mxu0 %v959_v25 }
  0xa1   : > { %628 = vmatpush1.bf16.xpose.msra.mxu1 %v981_v31 }
  0xa2   : > { %629 = vmatprep.subr.bf16.mxu1 %v982_v32 }
  0xa7   : > { %855 = vmatpush3.bf16.xpose.msra.mxu0 %v960_v28 }
  0xa9   : > { %630 = vmatpush1.bf16.xpose.msra.mxu1 %v984_v33 }
  0xae   : > { %857 = vmatmul.mubr.bf16.vlgmr.msra.gmra.mrb[0].mxu0 %v332_v8 }
 0x181   : > { %v523_v41 = vpop.f32.mrb[0].mxu0 }
 0x182   : > { %v524_v42 = vadd.f32 %v523_v41, %v386_v39  ;;  %v525_v43 = vpop.f32.mrb[1].mxu0 }
 0x183   : > { %v526_v44 = vadd.f32 %v525_v43, %v390_v40  ;;  %v527_v45 = vpop.f32.mrb[2].mxu0 }
 0x184   : > { %v530_v46 = vmax.f32 %v524_v42, 0.0  ;;  %v528_v47 = vpop.f32.mrb[3].mxu0 }
 0x185   : > { %v531_v48 = vmax.f32 %v526_v44, 0.0 }
 0x186   : > { %v533_v50 = vpack.c.bf16 %v530_v46, %v530_v46 }
 0x187   : > { %v534_v49 = vpack.c.bf16 %v531_v48, %v531_v48 }
 0x189   : > { %647 = vmatprep.mubr.bf16.mxu1 %v534_v49 }
 0x18a   : > { %648 = vmatmul.mubr.bf16.vlgmr.msra.gmra.mrb[0].mxu1 %v533_v50 }
 0x25d   : > { %v649_v52 = vpop.f32.mrb[0].mxu1 }
 0x25e   : > { %v655_v53 = vadd.f32 %v803_v51, %v649_v52  ;;  %v651_v54 = vpop.f32.mrb[1].mxu1 }
 0x25f   : > { %v652_v55 = vpop.f32.mrb[2].mxu1 }
 0x260   : > { %661 = vst [vmem:[%s310_s9] sm:$0xff] %v655_v53  ;;  %v653_v56 = vpop.f32.mrb[3].mxu1 }
 0x261   : > { %1084 = shalt.err (!%p1081_p11)
}
 0x262   : > { %s1085_s13 = scalar_lea.hbm %s1408_s8, 128  ;;  %s1089_s30 = scalar_lea.hbm %s1462_s5, 256 }
 0x263   : > { %p1086_p0 = scmp.ne.s32.totalorder %s1408_s8, %s1085_s13  ;;  %p1090_p6 = scmp.lt.u32.totalorder %s1408_s8, %s1462_s5 }
 0x264   : > { %p1091_p7 = scmp.lt.u32.totalorder %s1089_s30, %s1085_s13  ;;  %p1093_p8 = scmp.lt.u32.totalorder %s1085_s13, %s1408_s8 }
 0x265   : > { %p1087_p4 = pnand %p1086_p0, %p1477_p12 }
 0x266   : > { %p1092_p2 = por %p1091_p7, %p1090_p6 }
 0x267   : > { %p1088_p13 = pneg %p1087_p4 }
 0x268   : > { %p1094_p1 = por %p1093_p8, %p1092_p2 }
 0x26a   : > { %p1095_p10 = pnand %p1094_p1, %p1088_p13 }
 0x26c   : > { %1098 = shalt.err (!%p1095_p10)
}
 0x26d   : > { %868 = dma.vmem_to_hbm [thread:$0]  (%p1477_p12), %s1410_s11, 128, %s1408_s8, %s663_s21  }
 0x26e PF: > { %s688_s9 = sand.u32 1, %s1137_s18   ;;  %p1478_p3 = scmp.ne.s32.totalorder %s1470_s29, 0 }
 0x26f   : > { %p1479_p5 = scmp.ge.s32.totalorder %s1157_s23, 2  ;;  %s689_s15 = scalar_lea.sflag [#allocation5], %s688_s9 }
 0x271   : > { %p882_p9 = pnand %p1479_p5, %p1478_p3 }
 0x273   : > { %1132 = dma.done.wait (!%p882_p9), %s689_s15, 128  }
 0x274   : > { %1134 = vsyncadd (!%p882_p9), %s689_s15, 4294967168  ;;  %s22_s23 = sadd.s32 1, %s1157_s23   ;;  %s1480_s18 = smov %s1141_s19 }
 0x275   : > { %p19_p11 = scmp.ge.s32.totalorder %s22_s23, 4   ;;  %s1481_s19 = smov %s1145_s20 }
 0x276   : > { %s1482_s20 = smov %s1339_s17  ;;  %s1483_s21 = smov %s1153_s22 }
 0x277   : > { %s1484_s22 = smov %s1486_s12  ;;  %21 = sbr.rel (!%p19_p11) target bundleno = 7 (0x7), region = 106 }
 0x27e   :  { %694 = vsyncpa [#allocation4], 1 }
 0x27f   :  { %696 = vsyncpa [#allocation4 + $0x1], 1 }
 0x280   :  { %697 = vsyncpa [#allocation7], 1 }
 0x281   :  { %698 = vsyncpa [#allocation5], 1 }
 0x282   :  { %700 = vsyncpa [#allocation5 + $0x1], 1 }

</bundles_post_ra>
